<compile_context>
chip_gen: v6e
topology: v6e:2x2x1
jax: 0.10.0
libtpu: 0.0.40
codegen_flags: <defaults>
</compile_context>

<pallas_src>
import math
import jax
import jax.numpy as jnp
from jax.experimental import pallas as pl
from jax.experimental.pallas import tpu as pltpu

# ---------------- small config consistent with the module ----------------
B = 2                 # batch
N_POINTS = 64         # points per cloud
POINT_FEATS = 3       # extra per-point features -> F = 3 + 3 = 6
NUM_LATENTS = 16      # num_latents
EMBED_DIM = 32        # embed_dim
WIDTH = 64            # diffusion hidden width (stand-in denoiser)
DIFFUSION_STEPS = 1000
DIFFUSION_WEIGHT = 1.0

# ---- DDPM schedule: compile-time constants (hoisted out of the forward) ----
_BETAS = jnp.linspace(1e-4, 0.02, DIFFUSION_STEPS, dtype=jnp.float32)
_ALPHAS_CUMPROD = jnp.cumprod(1.0 - _BETAS)
SQRT_AC = jnp.sqrt(_ALPHAS_CUMPROD)
SQRT_1MAC = jnp.sqrt(1.0 - _ALPHAS_CUMPROD)


# ---------------------------------------------------------------------------
# Single fused kernel:
#   encoder (pool -> project -> + latent queries)
#   q_sample (x_t = sqrt_ac[t]*x0 + sqrt_1mac[t]*noise)
#   conditional MLP denoiser on the batch-flattened (B*L, D) activations
#   MSE sum reduction against the noise (already VMEM-resident)
# Outputs: clean latents [B, L, D] and sum-of-squared-error [1, 1] (SMEM).
# ---------------------------------------------------------------------------
def _e2e_train_kernel(pc_ref, coef_a_ref, coef_c_ref, temb_ref, ctx_ref,
                      noise_ref, w_pc_ref, lq_ref, w_in_ref, b_in_ref,
                      w_ctx_ref, w_out_ref, b_out_ref,
                      latents_ref, sse_ref):
    b, n, f = pc_ref.shape
    l, d = lq_ref.shape
    w = w_in_ref.shape[1]

    # --- encoder stand-in: mean-pool the points, then project (mean(pc@W) == mean(pc)@W) ---
    pooled = jnp.mean(pc_ref[...], axis=1)                                   # (B, F) f32
    pooled_proj = jnp.dot(pooled.astype(jnp.bfloat16), w_pc_ref[...],
                          preferred_element_type=jnp.float32)                # (B, D) f32
    clean = lq_ref[...][None, :, :] + pooled_proj[:, None, :]                # (B, L, D)
    latents_ref[...] = clean

    # --- q_sample: x_t = sqrt_ac[t] * x0 + sqrt_1mac[t] * noise (f32 elementwise) ---
    noise = noise_ref[...]                                                   # (B, L, D)
    xt = coef_a_ref[...] * clean + coef_c_ref[...] * noise                   # (B, L, D)

    # --- conditional MLP denoiser stand-in, batch flattened into the M dim ---
    # one combined per-batch bias: b_in + time_emb + ctx @ w_ctx  -> (B, W)
    bias = (b_in_ref[...] + temb_ref[...]
            + jnp.dot(ctx_ref[...].astype(jnp.bfloat16), w_ctx_ref[...],
                      preferred_element_type=jnp.float32))                   # (B, W)

    h = jnp.dot(xt.reshape(b * l, d).astype(jnp.bfloat16), w_in_ref[...],
                preferred_element_type=jnp.float32)                          # (B*L, W)
    h = jax.nn.gelu(h.reshape(b, l, w) + bias[:, None, :])                   # (B, L, W)
    pred = (jnp.dot(h.reshape(b * l, w).astype(jnp.bfloat16), w_out_ref[...],
                    preferred_element_type=jnp.float32)
            + b_out_ref[...])                                                # (B*L, D)

    # --- fused MSE reduction (sum of squared error) against the resident noise ---
    diff = pred - noise.reshape(b * l, d)
    sse_ref[0, 0] = jnp.sum(diff * diff)


# ---------------------------------------------------------------------------
# glue: time embedding, parameter init, forward wrapper
# ---------------------------------------------------------------------------
def timestep_embedding(t, dim, max_period=10000.0):
    half = dim // 2
    freqs = jnp.exp(-math.log(max_period) * jnp.arange(half, dtype=jnp.float32) / half)
    args = t.astype(jnp.float32)[:, None] * freqs[None, :]
    return jnp.concatenate([jnp.cos(args), jnp.sin(args)], axis=-1)


def init_params(key):
    ks = jax.random.split(key, 6)
    s = 0.02
    # weight matrices stored bf16 (MXU-native on v5e/v6e/v7x); biases/queries f32
    return dict(
        w_pc=(jax.random.normal(ks[0], (3 + POINT_FEATS, EMBED_DIM), jnp.float32) * s
              ).astype(jnp.bfloat16),
        latent_queries=jax.random.normal(ks[1], (NUM_LATENTS, EMBED_DIM), jnp.float32) * s,
        w_in=(jax.random.normal(ks[2], (EMBED_DIM, WIDTH), jnp.float32) * s
              ).astype(jnp.bfloat16),
        b_in=jnp.zeros((1, WIDTH), jnp.float32),
        w_ctx=(jax.random.normal(ks[3], (2 * EMBED_DIM, WIDTH), jnp.float32) * s
               ).astype(jnp.bfloat16),
        w_out=(jax.random.normal(ks[4], (WIDTH, EMBED_DIM), jnp.float32) * s
               ).astype(jnp.bfloat16),
        b_out=jnp.zeros((1, EMBED_DIM), jnp.float32),
    )


def end_to_end_forward(params, point_cloud, images, key):
    """Mirrors EndToEndModel.forward(..., mode='train')."""
    bsz = point_cloud.shape[0]
    l, d = params["latent_queries"].shape
    w = params["w_in"].shape[1]

    k_t, k_noise, k_cond = jax.random.split(key, 3)
    # condition = randn(B, 2*embed_dim) when images/texts are provided (content unused, as in torch)
    condition = (jax.random.normal(k_cond, (bsz, 2 * d), jnp.float32)
                 if images is not None else jnp.zeros((bsz, 2 * d), jnp.float32))

    t = jax.random.randint(k_t, (bsz,), 0, DIFFUSION_STEPS)
    noise = jax.random.normal(k_noise, (bsz, l, d), jnp.float32)

    # extract(): per-batch schedule coefficients, shaped for in-kernel broadcast
    coef_a = SQRT_AC[t].reshape(bsz, 1, 1)
    coef_c = SQRT_1MAC[t].reshape(bsz, 1, 1)
    temb = timestep_embedding(t, w)                                   # (B, W)

    latents, sse = pl.pallas_call(
        _e2e_train_kernel,
        out_shape=(jax.ShapeDtypeStruct((bsz, l, d), jnp.float32),
                   jax.ShapeDtypeStruct((1, 1), jnp.float32)),
        in_specs=[pl.BlockSpec(memory_space=pltpu.MemorySpace.VMEM)] * 13,
        out_specs=(pl.BlockSpec(memory_space=pltpu.MemorySpace.VMEM),
                   pl.BlockSpec(memory_space=pltpu.MemorySpace.SMEM)),
    )(point_cloud, coef_a, coef_c, temb, condition, noise,
      params["w_pc"], params["latent_queries"], params["w_in"], params["b_in"],
      params["w_ctx"], params["w_out"], params["b_out"])

    diffusion_loss = sse[0, 0] / float(bsz * l * d)     # F.mse_loss (mean)
    total_loss = DIFFUSION_WEIGHT * diffusion_loss

    return {
        "loss": total_loss,
        "diffusion_loss": diffusion_loss,
        "latents": latents,
    }


if __name__ == "__main__":
    key = jax.random.PRNGKey(0)
    k_param, k_pc, k_img, k_fwd = jax.random.split(key, 4)

    params = init_params(k_param)
    point_cloud = jax.random.normal(k_pc, (B, N_POINTS, 3 + POINT_FEATS), jnp.float32)
    images = jax.random.normal(k_img, (B, 3, 8, 8), jnp.float32)  # only toggles conditioning

    out = end_to_end_forward(params, point_cloud, images, k_fwd)
    jax.block_until_ready(out["loss"])
    print("KERNEL_OK")
</pallas_src>

<mosaic_0001>
module attributes {stable_mosaic.version = 11 : i64} {
  func.func @_e2e_train_kernel(%arg0: memref<2x64x6xf32, #tpu.memory_space<vmem>>, %arg1: memref<2x1x1xf32, #tpu.memory_space<vmem>>, %arg2: memref<2x1x1xf32, #tpu.memory_space<vmem>>, %arg3: memref<2x64xf32, #tpu.memory_space<vmem>>, %arg4: memref<2x64xf32, #tpu.memory_space<vmem>>, %arg5: memref<2x16x32xf32, #tpu.memory_space<vmem>>, %arg6: memref<6x32xbf16, #tpu.memory_space<vmem>>, %arg7: memref<16x32xf32, #tpu.memory_space<vmem>>, %arg8: memref<32x64xbf16, #tpu.memory_space<vmem>>, %arg9: memref<1x64xf32, #tpu.memory_space<vmem>>, %arg10: memref<64x64xbf16, #tpu.memory_space<vmem>>, %arg11: memref<64x32xbf16, #tpu.memory_space<vmem>>, %arg12: memref<1x32xf32, #tpu.memory_space<vmem>>, %arg13: memref<2x16x32xf32, #tpu.memory_space<vmem>>, %arg14: memref<1x1xf32, #tpu.memory_space<smem>>) attributes {dimension_semantics = [], scalar_prefetch = 0 : i64, scratch_operands = 0 : i64, tpu.core_type = #tpu.core_type<tc>} {
    %c0 = arith.constant 0 : index
    %c0_0 = arith.constant 0 : index
    %c0_1 = arith.constant 0 : index
    %0 = vector.load %arg0[%c0, %c0_0, %c0_1] : memref<2x64x6xf32, #tpu.memory_space<vmem>>, vector<2x64x6xf32>
    %cst = arith.constant dense<0.000000e+00> : vector<2x6xf32>
    %1 = vector.multi_reduction <add>, %0, %cst [1] : vector<2x64x6xf32> to vector<2x6xf32>
    %cst_2 = arith.constant 6.400000e+01 : f32
    %2 = vector.broadcast %cst_2 : f32 to vector<2x6xf32>
    %3 = arith.divf %1, %2 : vector<2x6xf32>
    %4 = arith.truncf %3 : vector<2x6xf32> to vector<2x6xbf16>
    %c0_3 = arith.constant 0 : index
    %c0_4 = arith.constant 0 : index
    %5 = vector.load %arg6[%c0_3, %c0_4] : memref<6x32xbf16, #tpu.memory_space<vmem>>, vector<6x32xbf16>
    %cst_5 = arith.constant dense<0.000000e+00> : vector<2x32xf32>
    %6 = tpu.matmul %4, %5, %cst_5 {dimension_numbers = #tpu.dot_dimension_numbers<[1], [0], [0], [1], [0, 0, 1, 1], [], []>} : vector<2x6xbf16>, vector<6x32xbf16>, vector<2x32xf32> -> vector<2x32xf32>
    %c0_6 = arith.constant 0 : index
    %c0_7 = arith.constant 0 : index
    %7 = vector.load %arg7[%c0_6, %c0_7] : memref<16x32xf32, #tpu.memory_space<vmem>>, vector<16x32xf32>
    %8 = vector.shape_cast %7 : vector<16x32xf32> to vector<1x16x32xf32>
    %9 = vector.shape_cast %6 : vector<2x32xf32> to vector<2x1x32xf32>
    %10 = vector.broadcast %8 : vector<1x16x32xf32> to vector<2x16x32xf32>
    %11 = vector.broadcast %9 : vector<2x1x32xf32> to vector<2x16x32xf32>
    %12 = arith.addf %10, %11 : vector<2x16x32xf32>
    %c0_8 = arith.constant 0 : index
    %c0_9 = arith.constant 0 : index
    %c0_10 = arith.constant 0 : index
    %13 = vector.load %arg13[%c0_8, %c0_9, %c0_10] : memref<2x16x32xf32, #tpu.memory_space<vmem>>, vector<2x16x32xf32>
    tpu.vector_store %arg13[%c0_8, %c0_9, %c0_10], %12 {strides = array<i32>} : memref<2x16x32xf32, #tpu.memory_space<vmem>>, vector<2x16x32xf32>,
    %c0_11 = arith.constant 0 : index
    %c0_12 = arith.constant 0 : index
    %c0_13 = arith.constant 0 : index
    %14 = vector.load %arg5[%c0_11, %c0_12, %c0_13] : memref<2x16x32xf32, #tpu.memory_space<vmem>>, vector<2x16x32xf32>
    %c0_14 = arith.constant 0 : index
    %c0_15 = arith.constant 0 : index
    %c0_16 = arith.constant 0 : index
    %15 = vector.load %arg1[%c0_14, %c0_15, %c0_16] : memref<2x1x1xf32, #tpu.memory_space<vmem>>, vector<2x1x1xf32>
    %16 = vector.broadcast %15 : vector<2x1x1xf32> to vector<2x16x32xf32>
    %17 = arith.mulf %16, %12 : vector<2x16x32xf32>
    %c0_17 = arith.constant 0 : index
    %c0_18 = arith.constant 0 : index
    %c0_19 = arith.constant 0 : index
    %18 = vector.load %arg2[%c0_17, %c0_18, %c0_19] : memref<2x1x1xf32, #tpu.memory_space<vmem>>, vector<2x1x1xf32>
    %19 = vector.broadcast %18 : vector<2x1x1xf32> to vector<2x16x32xf32>
    %20 = arith.mulf %19, %14 : vector<2x16x32xf32>
    %21 = arith.addf %17, %20 : vector<2x16x32xf32>
    %c0_20 = arith.constant 0 : index
    %c0_21 = arith.constant 0 : index
    %22 = vector.load %arg9[%c0_20, %c0_21] : memref<1x64xf32, #tpu.memory_space<vmem>>, vector<1x64xf32>
    %c0_22 = arith.constant 0 : index
    %c0_23 = arith.constant 0 : index
    %23 = vector.load %arg3[%c0_22, %c0_23] : memref<2x64xf32, #tpu.memory_space<vmem>>, vector<2x64xf32>
    %24 = vector.broadcast %22 : vector<1x64xf32> to vector<2x64xf32>
    %25 = arith.addf %24, %23 : vector<2x64xf32>
    %c0_24 = arith.constant 0 : index
    %c0_25 = arith.constant 0 : index
    %26 = vector.load %arg4[%c0_24, %c0_25] : memref<2x64xf32, #tpu.memory_space<vmem>>, vector<2x64xf32>
    %27 = arith.truncf %26 : vector<2x64xf32> to vector<2x64xbf16>
    %c0_26 = arith.constant 0 : index
    %c0_27 = arith.constant 0 : index
    %28 = vector.load %arg10[%c0_26, %c0_27] : memref<64x64xbf16, #tpu.memory_space<vmem>>, vector<64x64xbf16>
    %cst_28 = arith.constant dense<0.000000e+00> : vector<2x64xf32>
    %29 = tpu.matmul %27, %28, %cst_28 {dimension_numbers = #tpu.dot_dimension_numbers<[1], [0], [0], [1], [0, 0, 1, 1], [], []>} : vector<2x64xbf16>, vector<64x64xbf16>, vector<2x64xf32> -> vector<2x64xf32>
    %30 = arith.addf %25, %29 : vector<2x64xf32>
    %31 = vector.shape_cast %21 : vector<2x16x32xf32> to vector<32x32xf32>
    %32 = arith.truncf %31 : vector<32x32xf32> to vector<32x32xbf16>
    %c0_29 = arith.constant 0 : index
    %c0_30 = arith.constant 0 : index
    %33 = vector.load %arg8[%c0_29, %c0_30] : memref<32x64xbf16, #tpu.memory_space<vmem>>, vector<32x64xbf16>
    %cst_31 = arith.constant dense<0.000000e+00> : vector<32x64xf32>
    %34 = tpu.matmul %32, %33, %cst_31 {dimension_numbers = #tpu.dot_dimension_numbers<[1], [0], [0], [1], [0, 0, 1, 1], [], []>} : vector<32x32xbf16>, vector<32x64xbf16>, vector<32x64xf32> -> vector<32x64xf32>
    %35 = vector.shape_cast %34 : vector<32x64xf32> to vector<2x16x64xf32>
    %36 = vector.shape_cast %30 : vector<2x64xf32> to vector<2x1x64xf32>
    %37 = vector.broadcast %36 : vector<2x1x64xf32> to vector<2x16x64xf32>
    %38 = arith.addf %35, %37 : vector<2x16x64xf32>
    %39 = arith.mulf %38, %38 : vector<2x16x64xf32>
    %40 = arith.mulf %38, %39 : vector<2x16x64xf32>
    %cst_32 = arith.constant 4.471500e-02 : f32
    %41 = vector.broadcast %cst_32 : f32 to vector<2x16x64xf32>
    %42 = arith.mulf %41, %40 : vector<2x16x64xf32>
    %43 = arith.addf %38, %42 : vector<2x16x64xf32>
    %cst_33 = arith.constant 0.797884583 : f32
    %44 = vector.broadcast %cst_33 : f32 to vector<2x16x64xf32>
    %45 = arith.mulf %44, %43 : vector<2x16x64xf32>
    %46 = math.tanh %45 : vector<2x16x64xf32>
    %cst_34 = arith.constant 1.000000e+00 : f32
    %47 = vector.broadcast %cst_34 : f32 to vector<2x16x64xf32>
    %48 = arith.addf %47, %46 : vector<2x16x64xf32>
    %cst_35 = arith.constant 5.000000e-01 : f32
    %49 = vector.broadcast %cst_35 : f32 to vector<2x16x64xf32>
    %50 = arith.mulf %49, %48 : vector<2x16x64xf32>
    %51 = arith.mulf %38, %50 : vector<2x16x64xf32>
    %52 = vector.shape_cast %51 : vector<2x16x64xf32> to vector<32x64xf32>
    %53 = arith.truncf %52 : vector<32x64xf32> to vector<32x64xbf16>
    %c0_36 = arith.constant 0 : index
    %c0_37 = arith.constant 0 : index
    %54 = vector.load %arg11[%c0_36, %c0_37] : memref<64x32xbf16, #tpu.memory_space<vmem>>, vector<64x32xbf16>
    %cst_38 = arith.constant dense<0.000000e+00> : vector<32x32xf32>
    %55 = tpu.matmul %53, %54, %cst_38 {dimension_numbers = #tpu.dot_dimension_numbers<[1], [0], [0], [1], [0, 0, 1, 1], [], []>} : vector<32x64xbf16>, vector<64x32xbf16>, vector<32x32xf32> -> vector<32x32xf32>
    %c0_39 = arith.constant 0 : index
    %c0_40 = arith.constant 0 : index
    %56 = vector.load %arg12[%c0_39, %c0_40] : memref<1x32xf32, #tpu.memory_space<vmem>>, vector<1x32xf32>
    %57 = vector.broadcast %56 : vector<1x32xf32> to vector<32x32xf32>
    %58 = arith.addf %55, %57 : vector<32x32xf32>
    %59 = vector.shape_cast %14 : vector<2x16x32xf32> to vector<32x32xf32>
    %60 = arith.subf %58, %59 : vector<32x32xf32>
    %61 = arith.mulf %60, %60 : vector<32x32xf32>
    %62 = vector.shape_cast %61 : vector<32x32xf32> to vector<1x32x32xf32>
    %cst_41 = arith.constant dense<0.000000e+00> : vector<1xf32>
    %63 = vector.multi_reduction <add>, %62, %cst_41 [1, 2] : vector<1x32x32xf32> to vector<1xf32>
    %64 = vector.shape_cast %63 : vector<1xf32> to vector<1x1x1xf32>
    %65 = vector.extract %64[0, 0, 0] : f32 from vector<1x1x1xf32>
    %c0_42 = arith.constant 0 : index
    %c0_43 = arith.constant 0 : index
    %66 = memref.load %arg14[%c0_42, %c0_43] : memref<1x1xf32, #tpu.memory_space<smem>>
    memref.store %65, %arg14[%c0_42, %c0_43] : memref<1x1xf32, #tpu.memory_space<smem>>
    return
  }
}

</mosaic_0001>

<bundles_post_ra>
// kernel: tpu_custom_call.1
= control target key start
LH: loop header
LB: loop body
LE: loop exit
PB: predicated region body
PF: predicated region fallthrough
CT: control target
= control target key end

     0   :  { %20 = vsyncpa [#allocation3], 0  ;;  %vm124_vm0 = vcmask 1042432   ;;  %v792_v2 = vmov 0.0   ;;  %vm793_vm1 = vmmov 0   ;;  %vm65_vm2 = vcmask 48128   ;;  %s1073_s0 = inlined_call_operand.vmem [shape: f32[2,64,6], index: 0, kind: input, shape index: {}]   ;;  %s1074_s1 = inlined_call_operand.vmem [shape: f32[2,1,1], index: 1, kind: input, shape index: {}]   ;;  %s1075_s2 = inlined_call_operand.vmem [shape: f32[2,1,1], index: 2, kind: input, shape index: {}]   ;;  %s1076_s3 = inlined_call_operand.vmem [shape: f32[2,64], index: 3, kind: input, shape index: {}]   ;;  %s1077_s4 = inlined_call_operand.vmem [shape: f32[2,64], index: 4, kind: input, shape index: {}]   ;;  %s1078_s5 = inlined_call_operand.vmem [shape: f32[2,16,32], index: 5, kind: input, shape index: {}]   ;;  %s1079_s6 = inlined_call_operand.vmem [shape: bf16[6,32], index: 6, kind: input, shape index: {}]   ;;  %s1080_s7 = inlined_call_operand.vmem [shape: f32[16,32], index: 7, kind: input, shape index: {}]   ;;  %s1081_s8 = inlined_call_operand.vmem [shape: bf16[32,64], index: 8, kind: input, shape index: {}]   ;;  %s1082_s9 = inlined_call_operand.vmem [shape: f32[1,64], index: 9, kind: input, shape index: {}]   ;;  %s1083_s10 = inlined_call_operand.vmem [shape: bf16[64,64], index: 10, kind: input, shape index: {}]   ;;  %s1084_s11 = inlined_call_operand.vmem [shape: bf16[64,32], index: 11, kind: input, shape index: {}]   ;;  %s1085_s12 = inlined_call_operand.vmem [shape: f32[1,32], index: 12, kind: input, shape index: {}]   ;;  %s1086_s13 = inlined_call_operand.hbm [shape: f32[2,16,32], index: 13, kind: output, shape index: {0}]   ;;  %s1087_s14 = inlined_call_operand.hbm [shape: f32[1,1], index: 14, kind: output, shape index: {1}]  }
   0x1   :  { %v113_v0 = vld [vmem:[%s1079_s6] sm:$0x7]  ;;  %692 = vmatprep.subr.bf16.mxu1 %v792_v2  ;;  %694 = vmatprep.mubr.msk.bf16.mxu1 %vm793_vm1, %v792_v2  ;;  %v50_v4 = vld [vmem:[%s1073_s0 + $0x8] sm:$0xff]  ;;  %v51_v5 = vld [vmem:[%s1073_s0 + $0x10] sm:$0xff]  ;;  %v794_v40 = vmov 0  }
   0x2   :  { %v49_v1 = vld [vmem:[%s1073_s0] sm:$0xff]  ;;  %v126_v3 = vsel %vm124_vm0, %v113_v0, 0  ;;  %v52_v6 = vld [vmem:[%s1073_s0 + $0x18] sm:$0xff]  ;;  %v54_v8 = vld [vmem:[%s1073_s0 + $0x28] sm:$0xff]  ;;  %v67_v11 = vsel %vm65_vm2, %v50_v4, 0.0  ;;  %v69_v12 = vsel %vm65_vm2, %v51_v5, 0.0  ;;  %740 = vset.pattern.permute.xlu0 %v794_v40  ;;  %741 = vset.pattern.permute.xlu1 %v794_v40 }
   0x3   :  { %693 = vmatpush3.bf16.msra.mxu1 %v126_v3  ;;  %v53_v7 = vld [vmem:[%s1073_s0 + $0x20] sm:$0xff]  ;;  %v55_v9 = vld [vmem:[%s1073_s0 + $0x30] sm:$0xff]  ;;  %v66_v10 = vsel %vm65_vm2, %v49_v1, 0.0  ;;  %v56_v13 = vld [vmem:[%s1073_s0 + $0x38] sm:$0xff]  ;;  %v71_v17 = vsel %vm65_vm2, %v52_v6, 0.0  ;;  %v75_v22 = vsel %vm65_vm2, %v54_v8, 0.0 }
   0x4   :  { %v57_v14 = vld [vmem:[%s1073_s0 + $0x40] sm:$0xff]  ;;  %v58_v15 = vld [vmem:[%s1073_s0 + $0x48] sm:$0xff]  ;;  %v68_v16 = vadd.f32 %v67_v11, %v66_v10  ;;  %698 = vmatprep.subr.bf16.mxu1 %v792_v2  ;;  %v59_v18 = vld [vmem:[%s1073_s0 + $0x50] sm:$0xff]  ;;  %v73_v21 = vsel %vm65_vm2, %v53_v7, 0.0  ;;  %v77_v27 = vsel %vm65_vm2, %v55_v9, 0.0  ;;  %v79_v30 = vsel %vm65_vm2, %v56_v13, 0.0 }
   0x5   :  { %v60_v19 = vld [vmem:[%s1073_s0 + $0x58] sm:$0xff]  ;;  %v61_v20 = vld [vmem:[%s1073_s0 + $0x60] sm:$0xff]  ;;  %v87_v23 = vsel %vm65_vm2, %v57_v14, 0.0  ;;  %v62_v24 = vld [vmem:[%s1073_s0 + $0x68] sm:$0xff]  ;;  %v88_v28 = vsel %vm65_vm2, %v58_v15, 0.0  ;;  %v90_v29 = vsel %vm65_vm2, %v59_v18, 0.0 }
   0x6   :  { %v63_v25 = vld [vmem:[%s1073_s0 + $0x70] sm:$0xff]  ;;  %v70_v26 = vadd.f32 %v69_v12, %v68_v16  ;;  %v89_v31 = vadd.f32 %v88_v28, %v87_v23  ;;  %v92_v32 = vsel %vm65_vm2, %v60_v19, 0.0  ;;  %v94_v33 = vsel %vm65_vm2, %v61_v20, 0.0  ;;  %v654_v34 = vld [vmem:[%s1074_s1] ss:$0 sm:$0xff]  ;;  %v64_v44 = vld [vmem:[%s1073_s0 + $0x78] sm:$0xff] }
   0x7   :  { %v96_v36 = vsel %vm65_vm2, %v62_v24, 0.0  ;;  %v98_v37 = vsel %vm65_vm2, %v63_v25, 0.0  ;;  %v655_v38 = vld [vmem:[%s1074_s1 + $0x1] ss:$0 sm:$0xff]  ;;  %v656_v41 = vld [vmem:[%s1075_s2] ss:$0 sm:$0xff]  ;;  %229 = vperm.xlu0 %740, %v654_v34  }
   0x8   :  { %v72_v35 = vadd.f32 %v71_v17, %v70_v26  ;;  %v91_v39 = vadd.f32 %v90_v29, %v89_v31  ;;  %233 = vperm.xlu1 %741, %v655_v38   ;;  %v657_v43 = vld [vmem:[%s1075_s2 + $0x1] ss:$0 sm:$0xff]  ;;  %v100_v51 = vsel %vm65_vm2, %v64_v44, 0.0 }
   0xa   :  { %v74_v42 = vadd.f32 %v73_v21, %v72_v35  ;;  %v93_v45 = vadd.f32 %v92_v32, %v91_v39 }
   0xb   :  { %253 = vperm.xlu0 %740, %v656_v41  }
   0xc   :  { %v76_v46 = vadd.f32 %v75_v22, %v74_v42  ;;  %v95_v47 = vadd.f32 %v94_v33, %v93_v45  ;;  %257 = vperm.xlu1 %741, %v657_v43  }
   0xe   :  { %v78_v48 = vadd.f32 %v77_v27, %v76_v46  ;;  %v97_v49 = vadd.f32 %v96_v36, %v95_v47 }
  0x10   :  { %v80_v50 = vadd.f32 %v79_v30, %v78_v48 }
  0x11   :  { %21 = vsyncpa [#allocation4], 0  ;;  %v99_v52 = vadd.f32 %v98_v37, %v97_v49  ;;  %vm118_vm3 = vcmask 1041409   ;;  %v742_v10 = vld [vmem:[%s1083_s10 + $0x18] sm:$0xff]   ;;  %v743_v12 = vld [vmem:[%s1083_s10 + $0x10] sm:$0xff]   ;;  %vm311_vm4 = vcmask 523264   ;;  %v174_v20 = vlaneseq }
  0x12   :  { %v81_v53 = vrot.slane %v80_v50, 4  ;;  %v744_v13 = vld [vmem:[%s1083_s10 + $0x8] sm:$0xff]   ;;  %v745_v14 = vld [vmem:[%s1083_s10] sm:$0xff]   ;;  %v795_v18 = vmov 1966171168   ;;  %vm207_vm5 = vcmask 261120  }
  0x13   :  { %v101_v54 = vadd.f32 %v100_v51, %v99_v52  ;;  %v277_v15 = vld [vmem:[%s1077_s4] sm:$0x3]  ;;  %v746_v17 = vld [vmem:[%s1081_s8 + $0x8] sm:$0xff]   ;;  %v172_v19 = vunpack.c.l.s4 %v795_v18  ;;  %v175_v22 = vshrl.u32 %v174_v20, 7  ;;  %v1014_v45 = vld [vmem:[%s1078_s5 + $0x10] sm:$0xff] }
  0x14   :  { %v82_v55 = vadd.f32 %v81_v53, %v80_v50  ;;  %v278_v16 = vpack.c.bf16 %v277_v15, %v277_v15  ;;  %710 = vmatprep.subr.bf16.mxu0 %v746_v17  ;;  %v168_v32 = vld [vmem:[%s1080_s7] sm:$0xff]  ;;  %v169_v33 = vld [vmem:[%s1080_s7 + $0x8] sm:$0xff]  ;;  %v1019_v46 = vld [vmem:[%s1078_s5 + $0x18] sm:$0xff] }
  0x15   :  { %v102_v56 = vrot.slane %v101_v54, 4  ;;  %711 = vmatpush3.bf16.msra.mxu0 %v746_v17  ;;  %v173_v21 = vunpack.c.0.s8 %v172_v19  ;;  %v989_v27 = vsub.s32 0, %v175_v22  ;;  %v1003_v38 = vld [vmem:[%s1078_s5] sm:$0xff]  ;;  %v1008_v39 = vld [vmem:[%s1078_s5 + $0x8] sm:$0xff] }
  0x16   :  { %v83_v57 = vrot.slane %v82_v55, 2 }
  0x17   :  { %v103_v58 = vadd.f32 %v102_v56, %v101_v54  ;;  %v986_v23 = vsub.s32 %v173_v21, %v175_v22 }
  0x18   :  { %v84_v59 = vadd.f32 %v83_v57, %v82_v55 }
  0x19   :  { %v104_v60 = vrot.slane %v103_v58, 2 }
  0x1a   :  { %v85_v61 = vrot.slane %v84_v59, 1 }
  0x1b   :  { %v105_v62 = vadd.f32 %v104_v60, %v103_v58 }
  0x1c   :  { %v86_v63 = vadd.f32 %v85_v61, %v84_v59 }
  0x1d   :  { %v106_v0 = vrot.slane %v105_v62, 1 }
  0x1e   :  { %v109_v1 = vmul.f32 0.015625, %v86_v63 }
  0x1f   :  { %v107_v3 = vadd.f32 %v106_v0, %v105_v62 }
  0x20   :  { %v111_v4 = vpack.c.bf16 %v109_v1, %v109_v1 }
  0x21   :  { %v110_v5 = vmul.f32 0.015625, %v107_v3 }
  0x22   :  { %v116_v7 = vunpack.c.l.b16 %v111_v4  ;;  %v748_v4 = vld [vmem:[%s1084_s11 + $0x18] sm:$0xff]  }
  0x23   :  { %v112_v6 = vpack.c.bf16 %v110_v5, %v110_v5  ;;  %v749_v5 = vld [vmem:[%s1084_s11 + $0x10] sm:$0xff]  }
  0x25   :  { %v117_v8 = vunpack.c.l.b16 %v112_v6  ;;  %v750_v6 = vld [vmem:[%s1084_s11 + $0x8] sm:$0xff]  }
  0x27   :  { %v119_v9 = vsel %vm118_vm3, %v117_v8, %v116_v7  ;;  %v751_v7 = vld [vmem:[%s1084_s11] sm:$0xff]   ;;  %s796_s11 = smov [#allocation2]  }
  0x28   :  { %v120_v11 = vpack.c.b16 %v119_v9, %v119_v9  ;;  %v658_v8 = vld [vmem:[%s1082_s9] ss:$0 sm:$0xff] }
  0x29   :  { %v269_v9 = vld [vmem:[%s1076_s3] sm:$0x3] }
  0x2a   :  { %695 = vmatmul.mubr.msk.bf16.vlgmr.msra.gmra.mxu1 %vm65_vm2, %v120_v11 }
  0x2b   :  { %699 = vmatpush3.bf16.msra.mxu1 %v742_v10  ;;  %706 = vmatprep.mubr.msk.bf16.mxu1 %vm793_vm1, %v792_v2  ;;  %v276_v10 = vadd.f32 %v658_v8, %v269_v9 }
  0x2c   :  { %700 = vmatprep.subr.bf16.mxu1 %v792_v2 }
  0x2f   :  { %701 = vmatpush3.bf16.msra.mxu1 %v743_v12 }
  0x30   :  { %702 = vmatprep.subr.bf16.mxu1 %v792_v2 }
  0x33   :  { %703 = vmatpush3.bf16.msra.mxu1 %v744_v13 }
  0x34   :  { %704 = vmatprep.subr.bf16.mxu1 %v792_v2  ;;  %v747_v2 = vld [vmem:[%s1081_s8] sm:$0xff]  }
  0x35   :  { %712 = vmatprep.subr.bf16.mxu0 %v747_v2 }
  0x36   :  { %713 = vmatpush3.bf16.msra.mxu0 %v747_v2 }
  0x37   :  { %705 = vmatpush3.bf16.msra.mxu1 %v745_v14  ;;  %718 = vmatprep.subr.bf16.mxu0 %v748_v4 }
  0x3a   :  { %707 = vmatmul.mubr.msk.bf16.vlgmr.msra.gmra.mxu1 %vm311_vm4, %v278_v16 }
  0x82   :  { %v230_v24 = vpop.permute.xlu0 %229 }
  0x83   :  { %v234_v28 = vpop.permute.xlu1 %233 }
  0x86   :  { %v254_v37 = vpop.permute.xlu0 %253 }
  0x87   :  { %v258_v44 = vpop.permute.xlu1 %257  ;;  %v260_v47 = vmul.f32 %v254_v37, %v1003_v38  ;;  %v261_v48 = vmul.f32 %v254_v37, %v1008_v39 }
  0x88   :  { %v262_v53 = vmul.f32 %v258_v44, %v1014_v45  ;;  %v263_v54 = vmul.f32 %v258_v44, %v1019_v46 }
  0xea   :  { %v162_v25 = vpop.f32.mrf.mxu1 }
  0xeb   :  { %v177_v26 = vrot.slane %v162_v25, %v986_v23 }
  0xec   :  { %v696_v29 = vpop.f32.mrf.mxu1 }
  0xed   :  { %v178_v30 = vcombine.high %v177_v26, %v177_v26  ;;  %v185_v31 = vrot.slane %v177_v26, %v986_v23 }
  0xee   :  { %v165_v34 = vpop.f32.mrf.mxu1 }
  0xef   :  { %v192_v35 = vrot.slane %v178_v30, %v986_v23  ;;  %v196_v36 = vrot.slane %v185_v31, %v989_v27 }
  0xf0   :  { %v697_v40 = vpop.f32.mrf.mxu1 }
  0xf1   :  { %v203_v41 = vadd.f32 %v196_v36, %v168_v32  ;;  %v204_v42 = vadd.f32 %v196_v36, %v169_v33  ;;  %v200_v43 = vrot.slane %v192_v35, %v989_v27 }
  0xf3   :  { %208 = vst.msk [vmem:[#allocation2] sm:$0xff] %vm207_vm5, %v203_v41  ;;  %209 = vst.msk [vmem:[#allocation2 + $0x8] sm:$0xff] %vm207_vm5, %v204_v42  ;;  %v236_v49 = vmul.f32 %v230_v24, %v203_v41  ;;  %v237_v50 = vmul.f32 %v230_v24, %v204_v42  ;;  %v205_v51 = vadd.f32 %v200_v43, %v168_v32 }
  0xf4   :  { %v206_v52 = vadd.f32 %v200_v43, %v169_v33 }
  0xf5   :  { %210 = vst.msk [vmem:[#allocation2 + $0x10] sm:$0xff] %vm207_vm5, %v205_v51  ;;  %v238_v55 = vmul.f32 %v234_v28, %v205_v51  ;;  %v264_v57 = vadd.f32 %v260_v47, %v236_v49  ;;  %v265_v58 = vadd.f32 %v261_v48, %v237_v50 }
  0xf6   :  { %211 = vst.msk [vmem:[#allocation2 + $0x18] sm:$0xff] %vm207_vm5, %v206_v52  ;;  %v239_v56 = vmul.f32 %v234_v28, %v206_v52 }
  0xf7   :  { %v266_v59 = vadd.f32 %v262_v53, %v238_v55  ;;  %v356_v61 = vpack.c.bf16 %v265_v58, %v264_v57 }
  0xf8   :  { %v267_v60 = vadd.f32 %v263_v54, %v239_v56 }
  0xf9   :  { %714 = vmatprep.mubr.msk.bf16.mxu0 %vm207_vm5, %v356_v61 }
  0xfa   :  { %v357_v62 = vpack.c.bf16 %v267_v60, %v266_v59  ;;  %v349_v63 = vpop.f32.mrf.mxu1 }
  0xfb   :  { %v355_v11 = vadd.f32 %v349_v63, %v276_v10 }
  0xfc   :  { %715 = vmatmul.mubr.msk.bf16.vlgmr.msra.gmra.mxu0 %vm207_vm5, %v357_v62  ;;  %v708_v0 = vpop.f32.mrf.mxu1 }
  0xfd   :  { %719 = vmatpush3.bf16.msra.mxu0 %v748_v4  ;;  %v436_v12 = vrot.slane %v355_v11, %v986_v23 }
  0xfe   :  { %v352_v1 = vpop.f32.mrf.mxu1  ;;  %720 = vmatprep.subr.bf16.mxu0 %v749_v5 }
  0xff   :  { %v437_v13 = vcombine.high %v436_v12, %v436_v12  ;;  %v444_v15 = vrot.slane %v436_v12, %v986_v23 }
 0x100   :  { %v709_v3 = vpop.f32.mrf.mxu1 }
 0x101   :  { %721 = vmatpush3.bf16.msra.mxu0 %v749_v5  ;;  %v451_v14 = vrot.slane %v437_v13, %v986_v23  ;;  %v455_v17 = vrot.slane %v444_v15, %v989_v27  ;;  %v668_v5 = vld [vmem:[%s1085_s12] ss:$0 sm:$0xff]  ;;  %s629_s12 = sshll.u32 %s796_s11, 4  ;;  %s630_s12 = int_to_ptr.vmem [resolvable:$true] %s629_s12 }
 0x102   :  { %722 = vmatprep.subr.bf16.mxu0 %v750_v6  ;;  %s760_s30 = scalar_lea.vmem %s630_s12, 512  ;;  %p765_p1 = scmp.lt.s32.totalorder %s630_s12, %s630_s12 }
 0x103   :  { %v459_v16 = vrot.slane %v451_v14, %v989_v27  ;;  %p761_p0 = scmp.ne.s32.totalorder %s630_s12, %s760_s30  ;;  %p766_p2 = scmp.lt.s32.totalorder %s760_s30, %s760_s30 }
 0x105   :  { %723 = vmatpush3.bf16.msra.mxu0 %v750_v6  ;;  %p767_p3 = por %p766_p2, %p765_p1 }
 0x106   :  { %724 = vmatprep.subr.bf16.mxu0 %v751_v7 }
 0x107   :  { %p768_p4 = pnand %p767_p3, %p761_p0 }
 0x109   :  { %725 = vmatpush3.bf16.msra.mxu0 %v751_v7 }
 0x1bc   :  { %v716_v2 = vpop.f32.mrf.mxu0 }
 0x1bd   :  { %v464_v18 = vadd.f32 %v716_v2, %v459_v16 }
 0x1be   :  { %v414_v19 = vpop.f32.mrf.mxu0 }
 0x1bf   :  { %v468_v20 = vmul.f32 %v464_v18, %v464_v18  ;;  %v462_v21 = vadd.f32 %v455_v17, %v414_v19 }
 0x1c0   :  { %v717_v22 = vpop.f32.mrf.mxu0 }
 0x1c1   :  { %v472_v24 = vmul.f32 %v468_v20, %v464_v18  ;;  %v466_v25 = vmul.f32 %v462_v21, %v462_v21  ;;  %v465_v26 = vadd.f32 %v717_v22, %v459_v16 }
 0x1c2   :  { %v417_v28 = vpop.f32.mrf.mxu0 }
 0x1c3   :  { %v476_v29 = vmul.f32 0.044715, %v472_v24  ;;  %v470_v30 = vmul.f32 %v466_v25, %v462_v21  ;;  %v469_v31 = vmul.f32 %v465_v26, %v465_v26  ;;  %v463_v32 = vadd.f32 %v455_v17, %v417_v28 }
 0x1c5   :  { %v480_v33 = vadd.f32 %v476_v29, %v464_v18  ;;  %v474_v23 = vmul.f32 0.044715, %v470_v30  ;;  %v473_v34 = vmul.f32 %v469_v31, %v465_v26  ;;  %v467_v35 = vmul.f32 %v463_v32, %v463_v32 }
 0x1c7   :  { %v484_v36 = vmul.f32 0.7978846, %v480_v33  ;;  %v478_v27 = vadd.f32 %v474_v23, %v462_v21  ;;  %v477_v37 = vmul.f32 0.044715, %v473_v34  ;;  %v471_v40 = vmul.f32 %v467_v35, %v463_v32 }
 0x1c9   :  { %v482_v41 = vmul.f32 0.7978846, %v478_v27  ;;  %v481_v42 = vadd.f32 %v477_v37, %v465_v26  ;;  %v475_v43 = vmul.f32 0.044715, %v471_v40  ;;  %752 = vtanh.f32 %v484_v36 }
 0x1cb   :  { %754 = vtanh.f32 %v482_v41  ;;  %v485_v44 = vmul.f32 0.7978846, %v481_v42  ;;  %v479_v47 = vadd.f32 %v475_v43, %v463_v32 }
 0x1cd   :  { %756 = vtanh.f32 %v485_v44  ;;  %v483_v48 = vmul.f32 0.7978846, %v479_v47 }
 0x1cf   :  { %758 = vtanh.f32 %v483_v48 }
 0x1d6   :  { %v753_v49 = vpop.eup %752 }
 0x1d7   :  { %v492_v53 = vadd.f32 1.0, %v753_v49 }
 0x1d8   :  { %v755_v50 = vpop.eup %754 }
 0x1d9   :  { %v490_v51 = vadd.f32 1.0, %v755_v50  ;;  %v496_v59 = vmul.f32 0.5, %v492_v53 }
 0x1da   :  { %v757_v52 = vpop.eup %756 }
 0x1db   :  { %v493_v54 = vadd.f32 1.0, %v757_v52  ;;  %v494_v56 = vmul.f32 0.5, %v490_v51  ;;  %v500_v0 = vmul.f32 %v496_v59, %v464_v18 }
 0x1dc   :  { %v759_v55 = vpop.eup %758 }
 0x1dd   :  { %v497_v57 = vmul.f32 0.5, %v493_v54  ;;  %v491_v58 = vadd.f32 1.0, %v759_v55  ;;  %v498_v62 = vmul.f32 %v494_v56, %v462_v21 }
 0x1df   :  { %v495_v60 = vmul.f32 0.5, %v491_v58  ;;  %v501_v61 = vmul.f32 %v497_v57, %v465_v26 }
 0x1e1   :  { %v499_v63 = vmul.f32 %v495_v60, %v463_v32  ;;  %v503_v3 = vpack.c.bf16 %v501_v61, %v500_v0 }
 0x1e3   :  { %v502_v1 = vpack.c.bf16 %v499_v63, %v498_v62 }
 0x1e5   :  { %726 = vmatprep.mubr.msk.bf16.mxu0 %vm311_vm4, %v502_v1 }
 0x1e6   :  { %727 = vmatmul.mubr.msk.bf16.vlgmr.msra.gmra.mxu0 %vm311_vm4, %v503_v3 }
 0x2a6   :  { %v728_v4 = vpop.f32.mrf.mxu0 }
 0x2a7   :  { %v592_v7 = vadd.f32 %v728_v4, %v668_v5 }
 0x2a8   :  { %v583_v6 = vpop.f32.mrf.mxu0 }
 0x2a9   :  { %v584_v8 = vadd.f32 %v668_v5, %v583_v6  ;;  %v600_v13 = vsub.f32 %v592_v7, %v1014_v45 }
 0x2aa   :  { %v729_v9 = vpop.f32.mrf.mxu0 }
 0x2ab   :  { %v598_v10 = vsub.f32 %v584_v8, %v1003_v38  ;;  %v595_v11 = vadd.f32 %v729_v9, %v668_v5  ;;  %v604_v2 = vmul.f32 %v600_v13, %v600_v13 }
 0x2ac   :  { %v586_v12 = vpop.f32.mrf.mxu0 }
 0x2ad   :  { %v587_v14 = vadd.f32 %v668_v5, %v586_v12  ;;  %v602_v15 = vmul.f32 %v598_v10, %v598_v10  ;;  %v601_v16 = vsub.f32 %v595_v11, %v1019_v46  ;;  %v609_v38 = vsel %vm207_vm5, %v604_v2, 0.0 }
 0x2af   :  { %v599_v17 = vsub.f32 %v587_v14, %v1008_v39  ;;  %v606_v19 = vsel %vm207_vm5, %v602_v15, 0.0  ;;  %v605_v20 = vmul.f32 %v601_v16, %v601_v16 }
 0x2b1   :  { %v603_v18 = vmul.f32 %v599_v17, %v599_v17  ;;  %v611_v25 = vsel %vm207_vm5, %v605_v20, 0.0 }
 0x2b3   :  { %v607_v21 = vsel %vm207_vm5, %v603_v18, 0.0 }
 0x2b4   :  { %v608_v22 = vadd.f32 %v607_v21, %v606_v19 }
 0x2b6   :  { %v610_v24 = vadd.f32 %v609_v38, %v608_v22 }
 0x2b8   :  { %v612_v45 = vadd.f32 %v611_v25, %v610_v24 }
 0x2ba   :  { %613 = vadd.xlane.f32.xlu0 %v612_v45 }
 0x2bb   :  { %771 = shalt.err (!%p768_p4)
}
 0x2bc   :  { %s797_s4 = smov 128   ;;  %s798_s8 = smov 8  }
 0x2bd   :  { %635 = dma.vmem_to_hbm [thread:$0]  %s630_s12, 512, %s1086_s13, [#allocation3], %s797_s4, %s797_s4, %s798_s8  }
 0x2be   :  { %s799_s17 = smov [#allocation5]  }
 0x343   :  { %v614_v39 = vpop.xlane.xlu0 %613 }
 0x344   :  { %v615_v46 = vrot.slane %v614_v39, 4 }
 0x346   :  { %v616_v26 = vadd.f32 %v615_v46, %v614_v39 }
 0x348   :  { %v617_v28 = vrot.slane %v616_v26, 2 }
 0x34a   :  { %v618_v29 = vadd.f32 %v617_v28, %v616_v26 }
 0x34c   :  { %v619_v30 = vrot.slane %v618_v29, 1 }
 0x34e   :  { %v620_v31 = vadd.f32 %v619_v30, %v618_v29 }
 0x350   :  { %730 = vpush %v620_v31 }
 0x381   :  { %s731_s16 = spop %730 }
 0x382   :  { %623 = sst [smem:[#allocation5]] %s731_s16 }
 0x383   :  { %643 = dma.smem_to_hbm %s799_s17, 16, %s1087_s14, [#allocation4]  }
 0x384   :  { %788 = dma.done.wait [#allocation3], 512  }
 0x385   :  { %789 = vsyncadd [#allocation3], 4294966784 }
 0x386   :  { %790 = dma.done.wait [#allocation4], 16  }
 0x387   :  { %791 = vsyncadd [#allocation4], 4294967280 }
 0x388   :  { %650 = sfence }
 0x389   :  { %651 = vsyncpa [#allocation3], 1 }
 0x38a   :  { %652 = vsyncpa [#allocation4], 1 }

</bundles_post_ra>
